<compile_context>
chip_gen: v5e
topology: v5e:2x2
jax: 0.10.0
libtpu: 0.0.40
codegen_flags: <defaults>
</compile_context>

<pallas_src>
import jax
import jax.numpy as jnp
from jax.experimental import pallas as pl
from jax.experimental.pallas import tpu as pltpu


def qnet_kernel(x_ref, w1_ref, b1_ref, w2_ref, b2_ref, out_ref):
    # Two MXU matmuls with f32 accumulation; bias add + ReLU run on the VPU
    # (a different bundle slot) so they are free filler under the MXU work.
    cdt = w1_ref.dtype                                    # f32 (exact) or bf16 (fast)
    x = x_ref[...].astype(cdt)                            # [TB, S]
    h = jnp.dot(x, w1_ref[...],
                preferred_element_type=jnp.float32)       # [TB, Hp] f32
    h = jnp.maximum(h + b1_ref[...], 0.0)                 # bias + ReLU in f32
    o = jnp.dot(h.astype(cdt), w2_ref[...],
                preferred_element_type=jnp.float32)       # [TB, A] f32
    out_ref[...] = (o + b2_ref[...]).astype(out_ref.dtype)
    # TODO(synk): for real DQN workloads fuse the argmax / max-Q epilogue here so
    # the (TB, A=4) Q slab never round-trips to HBM and the store becomes a dense
    # lane-packed slab.  With the default exact-f32 matmuls the vmatmul slot
    # binds and the A=4 masked vst's hide under it (different bundle slot), so an
    # in-kernel transpose to an [A, TB] output was deliberately not added.


def qnet_forward(x, w1, b1, w2, b2, *, block_b=8192, use_bf16=False):
    """x: [B, state_dim] f32, w1: [S, H], b1: [1, H], w2: [H, A], b2: [1, A].

    Returns [B, action_dim] f32 (same semantics as the PyTorch forward; set
    use_bf16=True for the faster MXU path with ~1e-2-level numeric deviation).
    """
    B, S = x.shape
    H = w1.shape[1]
    A = w2.shape[1]

    # --- pad hidden dim to a multiple of 128 lanes (inert through ReLU) -----
    H_pad = max(128, ((H + 127) // 128) * 128)
    if H_pad != H:
        w1 = jnp.pad(w1, ((0, 0), (0, H_pad - H)))
        b1 = jnp.pad(b1, ((0, 0), (0, H_pad - H)))
        w2 = jnp.pad(w2, ((0, H_pad - H), (0, 0)))

    # Optional bf16 MXU-input fast path: weights cast once here (halves resident
    # weight bytes); x / h are cast in-kernel on the VPU so no extra wrapper-side
    # HBM pass over x is added.  Biases stay f32 (f32 bias-add / ReLU / output).
    if use_bf16:
        w1 = w1.astype(jnp.bfloat16)
        w2 = w2.astype(jnp.bfloat16)

    # --- batch tile ----------------------------------------------------------
    #  * big tiles amortize per-grid-step overhead and feed the HBM roofline.
    #  * B > 8  =>  TB <= cdiv(B, 2) rounded to 8, so the grid has >= 2 steps and
    #    the "parallel" batch axis shards across v7x's 2 TensorCores.
    #  * blocks must be multiples of 8 rows unless the block equals the full B.
    if B <= 8:
        TB = B                                   # single step; block == full array
    else:
        half = (B + 1) // 2                      # cdiv(B, 2) -> >= 2 grid steps
        TB = min(block_b, ((half + 7) // 8) * 8)
        TB = max(8, (TB // 8) * 8)
    grid = (pl.cdiv(B, TB),)

    act_bytes = 4
    w_bytes = 2 if use_bf16 else 4
    cost = pl.CostEstimate(
        flops=2 * B * (S * H_pad + H_pad * A),
        transcendentals=0,
        bytes_accessed=B * (S + A) * act_bytes
                       + (S * H_pad + H_pad * A) * w_bytes
                       + (H_pad + A) * act_bytes,
    )

    return pl.pallas_call(
        qnet_kernel,
        out_shape=jax.ShapeDtypeStruct((B, A), x.dtype),
        grid_spec=pltpu.PrefetchScalarGridSpec(
            num_scalar_prefetch=0,
            grid=grid,
            in_specs=[
                # x: batch-tiled; the i+1 DMA pipelines under step i's compute.
                # If xprof ever shows exposed x DMA at step boundaries, add
                # pipeline_mode=pl.Buffered(3) here (VMEM headroom is enormous).
                pl.BlockSpec((TB, S), lambda i: (i, 0)),
                pl.BlockSpec((S, H_pad), lambda i: (0, 0)),   # w1: VMEM-resident
                pl.BlockSpec((1, H_pad), lambda i: (0, 0)),   # b1: resident
                pl.BlockSpec((H_pad, A), lambda i: (0, 0)),   # w2: resident
                pl.BlockSpec((1, A), lambda i: (0, 0)),       # b2: resident
            ],
            out_specs=pl.BlockSpec((TB, A), lambda i: (i, 0)),
        ),
        compiler_params=pltpu.CompilerParams(
            dimension_semantics=("parallel",),   # shards batch over v7x's 2 TCs
        ),
        cost_estimate=cost,
    )(x, w1, b1, w2, b2)


def init_params(key, state_dim, hidden_dim, action_dim):
    """Deterministic init mimicking PyTorch Linear default (uniform +-1/sqrt(fan_in))."""
    k1, k2, k3, k4 = jax.random.split(key, 4)
    bound1 = 1.0 / jnp.sqrt(jnp.float32(state_dim))
    bound2 = 1.0 / jnp.sqrt(jnp.float32(hidden_dim))
    # Stored as [in, out] (transpose of PyTorch's [out, in]).
    w1 = jax.random.uniform(k1, (state_dim, hidden_dim), jnp.float32, -bound1, bound1)
    b1 = jax.random.uniform(k2, (1, hidden_dim), jnp.float32, -bound1, bound1)
    w2 = jax.random.uniform(k3, (hidden_dim, action_dim), jnp.float32, -bound2, bound2)
    b2 = jax.random.uniform(k4, (1, action_dim), jnp.float32, -bound2, bound2)
    return w1, b1, w2, b2


def _ref(x, w1, b1, w2, b2):
    return jnp.maximum(x @ w1 + b1, 0.0) @ w2 + b2


if __name__ == "__main__":
    state_dim = 8
    hidden_dim = 32
    action_dim = 4

    key = jax.random.PRNGKey(0)
    kx1, kx2, kx3, kp = jax.random.split(key, 4)
    w1, b1, w2, b2 = init_params(kp, state_dim, hidden_dim, action_dim)

    # --- tiny batch (single grid step, block == full array) -----------------
    x_small = jax.random.normal(kx1, (2, state_dim), jnp.float32)
    out_small = jax.block_until_ready(qnet_forward(x_small, w1, b1, w2, b2))
    assert out_small.shape == (2, action_dim)
    assert jnp.allclose(out_small, _ref(x_small, w1, b1, w2, b2),
                        atol=1e-5, rtol=1e-5)

    # --- default policy: >= 2 grid steps (v7x 2-TC split) + remainder tile --
    x_mid = jax.random.normal(kx2, (44, state_dim), jnp.float32)
    out_mid = jax.block_until_ready(qnet_forward(x_mid, w1, b1, w2, b2))
    assert out_mid.shape == (44, action_dim)
    assert jnp.allclose(out_mid, _ref(x_mid, w1, b1, w2, b2),
                        atol=1e-5, rtol=1e-5)

    # --- small block_b: 3-step grid with a remainder batch tile -------------
    out_mid2 = jax.block_until_ready(
        qnet_forward(x_mid, w1, b1, w2, b2, block_b=16))
    assert jnp.allclose(out_mid2, _ref(x_mid, w1, b1, w2, b2),
                        atol=1e-5, rtol=1e-5)

    # --- optional bf16 MXU-input fast path (looser tolerance) ---------------
    x_big = jax.random.normal(kx3, (64, state_dim), jnp.float32)
    out_bf16 = jax.block_until_ready(
        qnet_forward(x_big, w1, b1, w2, b2, use_bf16=True))
    assert out_bf16.shape == (64, action_dim)
    assert jnp.allclose(out_bf16, _ref(x_big, w1, b1, w2, b2),
                        atol=5e-2, rtol=5e-2)

    print("KERNEL_OK")
</pallas_src>

<mosaic_0001>
module attributes {stable_mosaic.version = 11 : i64} {
  func.func @qnet_kernel(%arg0: i32, %arg1: memref<2x8xf32, #tpu.memory_space<vmem>>, %arg2: memref<8x128xf32, #tpu.memory_space<vmem>>, %arg3: memref<1x128xf32, #tpu.memory_space<vmem>>, %arg4: memref<128x4xf32, #tpu.memory_space<vmem>>, %arg5: memref<1x4xf32, #tpu.memory_space<vmem>>, %arg6: memref<2x4xf32, #tpu.memory_space<vmem>>) attributes {dimension_semantics = [#tpu.dimension_semantics<parallel>], iteration_bounds = array<i64: 1>, scalar_prefetch = 0 : i64, scratch_operands = 0 : i64, tpu.core_type = #tpu.core_type<tc>, window_params = [{transform_indices = @transform_0, window_bounds = array<i64: 2, 8>}, {pipeline_mode = #tpu.pipeline_mode<synchronous>, transform_indices = @transform_1, window_bounds = array<i64: 8, 128>}, {pipeline_mode = #tpu.pipeline_mode<synchronous>, transform_indices = @transform_2, window_bounds = array<i64: 1, 128>}, {pipeline_mode = #tpu.pipeline_mode<synchronous>, transform_indices = @transform_3, window_bounds = array<i64: 128, 4>}, {pipeline_mode = #tpu.pipeline_mode<synchronous>, transform_indices = @transform_4, window_bounds = array<i64: 1, 4>}, {transform_indices = @transform_5, window_bounds = array<i64: 2, 4>}]} {
    %c0 = arith.constant 0 : index
    %c0_0 = arith.constant 0 : index
    %0 = vector.load %arg1[%c0, %c0_0] : memref<2x8xf32, #tpu.memory_space<vmem>>, vector<2x8xf32>
    %c0_1 = arith.constant 0 : index
    %c0_2 = arith.constant 0 : index
    %1 = vector.load %arg2[%c0_1, %c0_2] : memref<8x128xf32, #tpu.memory_space<vmem>>, vector<8x128xf32>
    %cst = arith.constant dense<0.000000e+00> : vector<2x128xf32>
    %2 = tpu.matmul %0, %1, %cst {dimension_numbers = #tpu.dot_dimension_numbers<[1], [0], [0], [1], [0, 0, 1, 1], [], []>} : vector<2x8xf32>, vector<8x128xf32>, vector<2x128xf32> -> vector<2x128xf32>
    %c0_3 = arith.constant 0 : index
    %c0_4 = arith.constant 0 : index
    %3 = vector.load %arg3[%c0_3, %c0_4] : memref<1x128xf32, #tpu.memory_space<vmem>>, vector<1x128xf32>
    %4 = vector.broadcast %3 : vector<1x128xf32> to vector<2x128xf32>
    %5 = arith.addf %2, %4 : vector<2x128xf32>
    %cst_5 = arith.constant 0.000000e+00 : f32
    %6 = vector.broadcast %cst_5 : f32 to vector<2x128xf32>
    %7 = arith.maximumf %5, %6 : vector<2x128xf32>
    %c0_6 = arith.constant 0 : index
    %c0_7 = arith.constant 0 : index
    %8 = vector.load %arg4[%c0_6, %c0_7] : memref<128x4xf32, #tpu.memory_space<vmem>>, vector<128x4xf32>
    %cst_8 = arith.constant dense<0.000000e+00> : vector<2x4xf32>
    %9 = tpu.matmul %7, %8, %cst_8 {dimension_numbers = #tpu.dot_dimension_numbers<[1], [0], [0], [1], [0, 0, 1, 1], [], []>} : vector<2x128xf32>, vector<128x4xf32>, vector<2x4xf32> -> vector<2x4xf32>
    %c0_9 = arith.constant 0 : index
    %c0_10 = arith.constant 0 : index
    %10 = vector.load %arg5[%c0_9, %c0_10] : memref<1x4xf32, #tpu.memory_space<vmem>>, vector<1x4xf32>
    %11 = vector.broadcast %10 : vector<1x4xf32> to vector<2x4xf32>
    %12 = arith.addf %9, %11 : vector<2x4xf32>
    %c0_11 = arith.constant 0 : index
    %c0_12 = arith.constant 0 : index
    %13 = vector.load %arg6[%c0_11, %c0_12] : memref<2x4xf32, #tpu.memory_space<vmem>>, vector<2x4xf32>
    tpu.vector_store %arg6[%c0_11, %c0_12], %12 {strides = array<i32>} : memref<2x4xf32, #tpu.memory_space<vmem>>, vector<2x4xf32>,
    return
  }
  func.func @transform_0(%arg0: i32) -> (i32, i32) {
    %c0_i32 = arith.constant 0 : i32
    %c0_i32_0 = arith.constant 0 : i32
    return %arg0, %c0_i32 : i32, i32
  }
  func.func @transform_1(%arg0: i32) -> (i32, i32) {
    %c0_i32 = arith.constant 0 : i32
    %c0_i32_0 = arith.constant 0 : i32
    %c0_i32_1 = arith.constant 0 : i32
    return %c0_i32, %c0_i32_0 : i32, i32
  }
  func.func @transform_2(%arg0: i32) -> (i32, i32) {
    %c0_i32 = arith.constant 0 : i32
    %c0_i32_0 = arith.constant 0 : i32
    %c0_i32_1 = arith.constant 0 : i32
    return %c0_i32, %c0_i32_0 : i32, i32
  }
  func.func @transform_3(%arg0: i32) -> (i32, i32) {
    %c0_i32 = arith.constant 0 : i32
    %c0_i32_0 = arith.constant 0 : i32
    %c0_i32_1 = arith.constant 0 : i32
    return %c0_i32, %c0_i32_0 : i32, i32
  }
  func.func @transform_4(%arg0: i32) -> (i32, i32) {
    %c0_i32 = arith.constant 0 : i32
    %c0_i32_0 = arith.constant 0 : i32
    %c0_i32_1 = arith.constant 0 : i32
    return %c0_i32, %c0_i32_0 : i32, i32
  }
  func.func @transform_5(%arg0: i32) -> (i32, i32) {
    %c0_i32 = arith.constant 0 : i32
    %c0_i32_0 = arith.constant 0 : i32
    return %arg0, %c0_i32 : i32, i32
  }
}

</mosaic_0001>

<bundles_post_ra>
// kernel: tpu_custom_call.1
= control target key start
LH: loop header
LB: loop body
LE: loop exit
PB: predicated region body
PF: predicated region fallthrough
CT: control target
= control target key end

     0   :  { %vm27_vm0 = vcmask 64512   ;;  %s234_s0 = inlined_call_operand.vmem [shape: f32[2,8], index: 0, kind: input, shape index: {}]   ;;  %s235_s1 = inlined_call_operand.vmem [shape: f32[8,128], index: 1, kind: input, shape index: {}]   ;;  %s236_s2 = inlined_call_operand.vmem [shape: f32[1,128], index: 2, kind: input, shape index: {}]   ;;  %s237_s3 = inlined_call_operand.vmem [shape: f32[128,4], index: 3, kind: input, shape index: {}]   ;;  %s238_s4 = inlined_call_operand.vmem [shape: f32[1,4], index: 4, kind: input, shape index: {}]   ;;  %s239_s5 = inlined_call_operand.hbm [shape: f32[2,4], index: 5, kind: output, shape index: {}]  }
   0x1   :  { %v22_v0 = vld [vmem:[%s235_s1] sm:$0xff]  ;;  %v67_v2 = vld [vmem:[%s237_s3 + $0x78] sm:$0xff]  ;;  %v66_v3 = vld [vmem:[%s237_s3 + $0x70] sm:$0xff] }
   0x2   :  { %v21_v1 = vld [vmem:[%s234_s0] sm:$0x3]  ;;  %46 = vmatpush.msra.mxu0 %v22_v0  ;;  %72 = vmatpush.msra.mxu1 %v67_v2  ;;  %v65_v4 = vld [vmem:[%s237_s3 + $0x68] sm:$0xff]  ;;  %v63_v6 = vld [vmem:[%s237_s3 + $0x58] sm:$0xff] }
   0x3   :  { %110 = vmatmul.msk.f32.vlgmr.msra.gmra.mxu0 %vm27_vm0, %v21_v1  ;;  %v64_v5 = vld [vmem:[%s237_s3 + $0x60] sm:$0xff] }
   0x4   :  { %73 = vmatpush.msra.mxu1 %v66_v3 }
   0x6   :  { %74 = vmatpush.msra.mxu1 %v65_v4 }
   0x7   :  { %10 = vsyncpa [#allocation3], 0  ;;  %v62_v7 = vld [vmem:[%s237_s3 + $0x50] sm:$0xff]  ;;  %v61_v8 = vld [vmem:[%s237_s3 + $0x48] sm:$0xff]  ;;  %s140_s29 = smov [#allocation2]   ;;  %s101_s8 = sshll.u32 %s239_s5, 4  ;;  %s102_s8 = int_to_ptr.hbm [resolvable:$true] %s101_s8 }
   0x8   :  { %75 = vmatpush.msra.mxu1 %v64_v5  ;;  %v60_v9 = vld [vmem:[%s237_s3 + $0x40] sm:$0xff]  ;;  %v59_v10 = vld [vmem:[%s237_s3 + $0x38] sm:$0xff]  ;;  %v58_v11 = vld [vmem:[%s237_s3 + $0x30] sm:$0xff]  ;;  %s99_s30 = sshll.u32 %s140_s29, 4  ;;  %vm92_vm1 = vcmask 25600   ;;  %s100_s30 = int_to_ptr.vmem [resolvable:$true] %s99_s30 }
   0x9   :  { %v57_v12 = vld [vmem:[%s237_s3 + $0x28] sm:$0xff]  ;;  %v56_v13 = vld [vmem:[%s237_s3 + $0x20] sm:$0xff]  ;;  %v55_v14 = vld [vmem:[%s237_s3 + $0x18] sm:$0xff] }
   0xa   :  { %76 = vmatpush.msra.mxu1 %v63_v6  ;;  %v54_v15 = vld [vmem:[%s237_s3 + $0x10] sm:$0xff]  ;;  %v53_v16 = vld [vmem:[%s237_s3 + $0x8] sm:$0xff]  ;;  %v52_v17 = vld [vmem:[%s237_s3] sm:$0xff] }
   0xb   :  { %v112_v18 = vld [vmem:[%s236_s2] ss:$0 sm:$0xff] }
   0xc   :  { %77 = vmatpush.msra.mxu1 %v62_v7  ;;  %v113_v22 = vld [vmem:[%s238_s4] ss:$0 sm:$0xff] }
   0xe   :  { %78 = vmatpush.msra.mxu1 %v61_v8 }
  0x10   :  { %79 = vmatpush.msra.mxu1 %v60_v9 }
  0x12   :  { %80 = vmatpush.msra.mxu1 %v59_v10 }
  0x14   :  { %81 = vmatpush.msra.mxu1 %v58_v11 }
  0x16   :  { %82 = vmatpush.msra.mxu1 %v57_v12 }
  0x18   :  { %83 = vmatpush.msra.mxu1 %v56_v13 }
  0x1a   :  { %84 = vmatpush.msra.mxu1 %v55_v14 }
  0x1c   :  { %85 = vmatpush.msra.mxu1 %v54_v15 }
  0x1e   :  { %86 = vmatpush.msra.mxu1 %v53_v16 }
  0x20   :  { %87 = vmatpush.msra.mxu1 %v52_v17 }
  0x80   :  { %v48_v19 = vpop.f32.mrf.mxu0 }
  0x81   :  { %v49_v20 = vadd.f32 %v112_v18, %v48_v19 }
  0x83   :  { %v51_v21 = vmax.f32 %v49_v20, 0.0 }
  0x85   :  { %88 = vmatmul.f32.vlgmr.msra.gmra.mxu1 %v51_v21 }
 0x102   :  { %v89_v23 = vpop.f32.mrf.mxu1 }
 0x103   :  { %v90_v24 = vadd.f32 %v113_v22, %v89_v23 }
 0x105   :  { %93 = vst.msk [vmem:[#allocation2] sm:$0x3] %vm92_vm1, %v90_v24 }
 0x106   :  { %104 = dma.vmem_to_hbm [thread:$0]  %s100_s30, 32, %s102_s8, [#allocation3]  }
 0x107   :  { %138 = dma.done.wait [#allocation3], 32  }
 0x108   :  { %139 = vsyncadd [#allocation3], 4294967264 }
 0x109   :  { %109 = vsyncpa [#allocation3], 1 }

</bundles_post_ra>
